<compile_context>
chip_gen: v7x
topology: tpu7x:2x2x1
jax: 0.10.0
libtpu: 0.0.40
codegen_flags: <defaults>
</compile_context>

<pallas_src>
import functools

import jax
import jax.numpy as jnp
import numpy as np
from jax import lax
from jax.experimental import pallas as pl
from jax.experimental.pallas import tpu as pltpu


def _dwconv_kernel(x_ref, w_ref, b_ref, o_ref, *, HW, W):
    """Depthwise 3x3 conv (+bias) on one (Bb, C, HW) lane-dense block.

    w_ref[t] is the (C, HW) weight of tap t, already multiplied by that tap's
    zero-padding boundary mask and broadcast along lanes, so the body is pure
    roll + fused multiply-add.
    """
    x = x_ref[...]                       # (Bb, C, HW)
    acc = x * w_ref[4]                   # center tap (di=0, dj=0): no roll

    t = 0
    for di in (-1, 0, 1):
        for dj in (-1, 0, 1):
            if di == 0 and dj == 0:
                t += 1
                continue
            off = di * W + dj            # flattened spatial tap offset
            # tap[p] = x[p + off] (circular roll on the lane axis; lanes that
            # wrap out of the image have zero weight in w_ref[t]).
            tap = pltpu.roll(x, shift=(-off) % HW, axis=2)
            acc = acc + tap * w_ref[t]
            t += 1

    o_ref[...] = (acc + b_ref[...]).astype(o_ref.dtype)


def _pick_block_batch(B, per_batch_bytes):
    """Largest divisor of B with block <= ~2 MiB; keep >= 2 grid steps
    (v7x dual-TC occupancy) once there is >= ~2 MiB of total work to split."""
    cap = 2 << 20
    divisors = [d for d in range(1, B + 1) if B % d == 0]
    fitting = [d for d in divisors if d * per_batch_bytes <= cap] or [1]
    bb = max(fitting)
    if bb == B and B >= 2 and B * per_batch_bytes >= cap:
        bb = max(d for d in divisors if d < B)
    return bb


def dwconv_pallas(x, weight, bias):
    """x: (B, C, H, W); weight: (C, 3, 3); bias: (C,). Returns (B, C, H, W)."""
    B, C, H, W = x.shape
    HW = H * W
    dtype = x.dtype

    # ---- Lane-dense activations: last (lane) dim is H*W. ----
    x_flat = x.reshape(B, C, HW)

    # ---- Hoisted masked weights: (9, C, HW). w_masked[t, c, p] =
    #      weight[c, t//3, t%3] * [position p's tap-t source lies inside the
    #      image] -- reproduces the conv's zero padding and pre-broadcasts the
    #      per-channel weight along lanes. ----
    p = jnp.arange(HW, dtype=jnp.int32)
    row, col = p // W, p % W
    masks = []
    for di in (-1, 0, 1):
        for dj in (-1, 0, 1):
            valid = ((row + di >= 0) & (row + di < H) &
                     (col + dj >= 0) & (col + dj < W))
            masks.append(valid.astype(dtype))
    mask = jnp.stack(masks)                                       # (9, HW)
    w_taps = jnp.transpose(weight.reshape(C, 9).astype(dtype))    # (9, C)
    w_masked = w_taps[:, :, None] * mask[:, None, :]              # (9, C, HW)

    # ---- Bias pre-broadcast along lanes. ----
    b_lanes = jnp.broadcast_to(bias.astype(dtype).reshape(C, 1), (C, HW))

    # ---- Block sizing: fold batch so each step moves ~MiB of data. ----
    itemsize = jnp.dtype(dtype).itemsize
    Bb = _pick_block_batch(B, C * HW * itemsize)
    grid = (B // Bb,)

    kern = functools.partial(_dwconv_kernel, HW=HW, W=W)

    cost = pl.CostEstimate(
        flops=18 * B * C * HW,                                  # 9 mul + 9 add
        transcendentals=0,
        bytes_accessed=(2 * B * C * HW + 9 * C * HW + C * HW) * itemsize)

    out_flat = pl.pallas_call(
        kern,
        out_shape=jax.ShapeDtypeStruct((B, C, HW), dtype),
        grid=grid,
        in_specs=[
            pl.BlockSpec((Bb, C, HW), lambda b: (b, 0, 0)),     # activations
            pl.BlockSpec((9, C, HW), lambda b: (0, 0, 0)),      # masked weights
            pl.BlockSpec((C, HW), lambda b: (0, 0)),            # bias (lanes)
        ],
        out_specs=pl.BlockSpec((Bb, C, HW), lambda b: (b, 0, 0)),
        compiler_params=pltpu.CompilerParams(
            dimension_semantics=("parallel",),
            # Headroom for larger blocks while staying under v7x's 64 MiB
            # physical VMEM (re-derive if C/H/W grow: ~2x in + 2x out blocks
            # + resident weights must fit).
            vmem_limit_bytes=48 * 1024 * 1024),
        cost_estimate=cost,
    )(x_flat, w_masked, b_lanes)

    return out_flat.reshape(B, C, H, W)


def dwconv_ref(x, weight, bias):
    """Pure-JAX reference matching torch.nn.Conv2d(C, C, 3, 1, 1, groups=C)."""
    B, C, H, W = x.shape
    dn = ("NCHW", "OIHW", "NCHW")
    y = lax.conv_general_dilated(
        x, weight.reshape(C, 1, 3, 3), (1, 1), [(1, 1), (1, 1)],
        dimension_numbers=dn, feature_group_count=C)
    return y + bias.reshape(1, C, 1, 1)


if __name__ == "__main__":
    B, C, H, W = 2, 16, 16, 16

    key = jax.random.PRNGKey(0)
    kx, kw, kb = jax.random.split(key, 3)
    x = jax.random.normal(kx, (B, C, H, W), jnp.float32)
    weight = 0.2 * jax.random.normal(kw, (C, 3, 3), jnp.float32)
    bias = 0.1 * jax.random.normal(kb, (C,), jnp.float32)

    out = jax.block_until_ready(dwconv_pallas(x, weight, bias))
    ref = jax.block_until_ready(dwconv_ref(x, weight, bias))

    np.testing.assert_allclose(np.asarray(out), np.asarray(ref),
                               rtol=1e-4, atol=1e-4)
    print("KERNEL_OK")
</pallas_src>

<mosaic_0001>
module attributes {stable_mosaic.version = 11 : i64} {
  func.func @_dwconv_kernel(%arg0: i32, %arg1: memref<2x16x256xf32, #tpu.memory_space<vmem>>, %arg2: memref<9x16x256xf32, #tpu.memory_space<vmem>>, %arg3: memref<16x256xf32, #tpu.memory_space<vmem>>, %arg4: memref<2x16x256xf32, #tpu.memory_space<vmem>>) attributes {dimension_semantics = [#tpu.dimension_semantics<parallel>], iteration_bounds = array<i64: 1>, scalar_prefetch = 0 : i64, scratch_operands = 0 : i64, tpu.core_type = #tpu.core_type<tc>, window_params = [{transform_indices = @transform_0, window_bounds = array<i64: 2, 16, 256>}, {pipeline_mode = #tpu.pipeline_mode<synchronous>, transform_indices = @transform_1, window_bounds = array<i64: 9, 16, 256>}, {pipeline_mode = #tpu.pipeline_mode<synchronous>, transform_indices = @transform_2, window_bounds = array<i64: 16, 256>}, {transform_indices = @transform_3, window_bounds = array<i64: 2, 16, 256>}]} {
    %c0 = arith.constant 0 : index
    %c0_0 = arith.constant 0 : index
    %c0_1 = arith.constant 0 : index
    %0 = vector.load %arg1[%c0, %c0_0, %c0_1] : memref<2x16x256xf32, #tpu.memory_space<vmem>>, vector<2x16x256xf32>
    %c4 = arith.constant 4 : index
    %c0_2 = arith.constant 0 : index
    %c0_3 = arith.constant 0 : index
    %1 = vector.load %arg2[%c4, %c0_2, %c0_3] : memref<9x16x256xf32, #tpu.memory_space<vmem>>, vector<1x16x256xf32>
    %2 = vector.shape_cast %1 : vector<1x16x256xf32> to vector<16x256xf32>
    %3 = vector.shape_cast %2 : vector<16x256xf32> to vector<1x16x256xf32>
    %4 = vector.broadcast %3 : vector<1x16x256xf32> to vector<2x16x256xf32>
    %5 = arith.mulf %0, %4 : vector<2x16x256xf32>
    %c17_i32 = arith.constant 17 : i32
    %6 = tpu.dynamic_rotate %0 by %c17_i32 dim 2 : vector<2x16x256xf32>, i32 -> vector<2x16x256xf32>
    %c0_4 = arith.constant 0 : index
    %c0_5 = arith.constant 0 : index
    %c0_6 = arith.constant 0 : index
    %7 = vector.load %arg2[%c0_4, %c0_5, %c0_6] : memref<9x16x256xf32, #tpu.memory_space<vmem>>, vector<1x16x256xf32>
    %8 = vector.shape_cast %7 : vector<1x16x256xf32> to vector<16x256xf32>
    %9 = vector.shape_cast %8 : vector<16x256xf32> to vector<1x16x256xf32>
    %10 = vector.broadcast %9 : vector<1x16x256xf32> to vector<2x16x256xf32>
    %11 = arith.mulf %6, %10 : vector<2x16x256xf32>
    %12 = arith.addf %5, %11 : vector<2x16x256xf32>
    %c16_i32 = arith.constant 16 : i32
    %13 = tpu.dynamic_rotate %0 by %c16_i32 dim 2 : vector<2x16x256xf32>, i32 -> vector<2x16x256xf32>
    %c1 = arith.constant 1 : index
    %c0_7 = arith.constant 0 : index
    %c0_8 = arith.constant 0 : index
    %14 = vector.load %arg2[%c1, %c0_7, %c0_8] : memref<9x16x256xf32, #tpu.memory_space<vmem>>, vector<1x16x256xf32>
    %15 = vector.shape_cast %14 : vector<1x16x256xf32> to vector<16x256xf32>
    %16 = vector.shape_cast %15 : vector<16x256xf32> to vector<1x16x256xf32>
    %17 = vector.broadcast %16 : vector<1x16x256xf32> to vector<2x16x256xf32>
    %18 = arith.mulf %13, %17 : vector<2x16x256xf32>
    %19 = arith.addf %12, %18 : vector<2x16x256xf32>
    %c15_i32 = arith.constant 15 : i32
    %20 = tpu.dynamic_rotate %0 by %c15_i32 dim 2 : vector<2x16x256xf32>, i32 -> vector<2x16x256xf32>
    %c2 = arith.constant 2 : index
    %c0_9 = arith.constant 0 : index
    %c0_10 = arith.constant 0 : index
    %21 = vector.load %arg2[%c2, %c0_9, %c0_10] : memref<9x16x256xf32, #tpu.memory_space<vmem>>, vector<1x16x256xf32>
    %22 = vector.shape_cast %21 : vector<1x16x256xf32> to vector<16x256xf32>
    %23 = vector.shape_cast %22 : vector<16x256xf32> to vector<1x16x256xf32>
    %24 = vector.broadcast %23 : vector<1x16x256xf32> to vector<2x16x256xf32>
    %25 = arith.mulf %20, %24 : vector<2x16x256xf32>
    %26 = arith.addf %19, %25 : vector<2x16x256xf32>
    %c1_i32 = arith.constant 1 : i32
    %27 = tpu.dynamic_rotate %0 by %c1_i32 dim 2 : vector<2x16x256xf32>, i32 -> vector<2x16x256xf32>
    %c3 = arith.constant 3 : index
    %c0_11 = arith.constant 0 : index
    %c0_12 = arith.constant 0 : index
    %28 = vector.load %arg2[%c3, %c0_11, %c0_12] : memref<9x16x256xf32, #tpu.memory_space<vmem>>, vector<1x16x256xf32>
    %29 = vector.shape_cast %28 : vector<1x16x256xf32> to vector<16x256xf32>
    %30 = vector.shape_cast %29 : vector<16x256xf32> to vector<1x16x256xf32>
    %31 = vector.broadcast %30 : vector<1x16x256xf32> to vector<2x16x256xf32>
    %32 = arith.mulf %27, %31 : vector<2x16x256xf32>
    %33 = arith.addf %26, %32 : vector<2x16x256xf32>
    %c255_i32 = arith.constant 255 : i32
    %34 = tpu.dynamic_rotate %0 by %c255_i32 dim 2 : vector<2x16x256xf32>, i32 -> vector<2x16x256xf32>
    %c5 = arith.constant 5 : index
    %c0_13 = arith.constant 0 : index
    %c0_14 = arith.constant 0 : index
    %35 = vector.load %arg2[%c5, %c0_13, %c0_14] : memref<9x16x256xf32, #tpu.memory_space<vmem>>, vector<1x16x256xf32>
    %36 = vector.shape_cast %35 : vector<1x16x256xf32> to vector<16x256xf32>
    %37 = vector.shape_cast %36 : vector<16x256xf32> to vector<1x16x256xf32>
    %38 = vector.broadcast %37 : vector<1x16x256xf32> to vector<2x16x256xf32>
    %39 = arith.mulf %34, %38 : vector<2x16x256xf32>
    %40 = arith.addf %33, %39 : vector<2x16x256xf32>
    %c241_i32 = arith.constant 241 : i32
    %41 = tpu.dynamic_rotate %0 by %c241_i32 dim 2 : vector<2x16x256xf32>, i32 -> vector<2x16x256xf32>
    %c6 = arith.constant 6 : index
    %c0_15 = arith.constant 0 : index
    %c0_16 = arith.constant 0 : index
    %42 = vector.load %arg2[%c6, %c0_15, %c0_16] : memref<9x16x256xf32, #tpu.memory_space<vmem>>, vector<1x16x256xf32>
    %43 = vector.shape_cast %42 : vector<1x16x256xf32> to vector<16x256xf32>
    %44 = vector.shape_cast %43 : vector<16x256xf32> to vector<1x16x256xf32>
    %45 = vector.broadcast %44 : vector<1x16x256xf32> to vector<2x16x256xf32>
    %46 = arith.mulf %41, %45 : vector<2x16x256xf32>
    %47 = arith.addf %40, %46 : vector<2x16x256xf32>
    %c240_i32 = arith.constant 240 : i32
    %48 = tpu.dynamic_rotate %0 by %c240_i32 dim 2 : vector<2x16x256xf32>, i32 -> vector<2x16x256xf32>
    %c7 = arith.constant 7 : index
    %c0_17 = arith.constant 0 : index
    %c0_18 = arith.constant 0 : index
    %49 = vector.load %arg2[%c7, %c0_17, %c0_18] : memref<9x16x256xf32, #tpu.memory_space<vmem>>, vector<1x16x256xf32>
    %50 = vector.shape_cast %49 : vector<1x16x256xf32> to vector<16x256xf32>
    %51 = vector.shape_cast %50 : vector<16x256xf32> to vector<1x16x256xf32>
    %52 = vector.broadcast %51 : vector<1x16x256xf32> to vector<2x16x256xf32>
    %53 = arith.mulf %48, %52 : vector<2x16x256xf32>
    %54 = arith.addf %47, %53 : vector<2x16x256xf32>
    %c239_i32 = arith.constant 239 : i32
    %55 = tpu.dynamic_rotate %0 by %c239_i32 dim 2 : vector<2x16x256xf32>, i32 -> vector<2x16x256xf32>
    %c8 = arith.constant 8 : index
    %c0_19 = arith.constant 0 : index
    %c0_20 = arith.constant 0 : index
    %56 = vector.load %arg2[%c8, %c0_19, %c0_20] : memref<9x16x256xf32, #tpu.memory_space<vmem>>, vector<1x16x256xf32>
    %57 = vector.shape_cast %56 : vector<1x16x256xf32> to vector<16x256xf32>
    %58 = vector.shape_cast %57 : vector<16x256xf32> to vector<1x16x256xf32>
    %59 = vector.broadcast %58 : vector<1x16x256xf32> to vector<2x16x256xf32>
    %60 = arith.mulf %55, %59 : vector<2x16x256xf32>
    %61 = arith.addf %54, %60 : vector<2x16x256xf32>
    %c0_21 = arith.constant 0 : index
    %c0_22 = arith.constant 0 : index
    %62 = vector.load %arg3[%c0_21, %c0_22] : memref<16x256xf32, #tpu.memory_space<vmem>>, vector<16x256xf32>
    %63 = vector.shape_cast %62 : vector<16x256xf32> to vector<1x16x256xf32>
    %64 = vector.broadcast %63 : vector<1x16x256xf32> to vector<2x16x256xf32>
    %65 = arith.addf %61, %64 : vector<2x16x256xf32>
    %c0_23 = arith.constant 0 : index
    %c0_24 = arith.constant 0 : index
    %c0_25 = arith.constant 0 : index
    %66 = vector.load %arg4[%c0_23, %c0_24, %c0_25] : memref<2x16x256xf32, #tpu.memory_space<vmem>>, vector<2x16x256xf32>
    tpu.vector_store %arg4[%c0_23, %c0_24, %c0_25], %65 {strides = array<i32>} : memref<2x16x256xf32, #tpu.memory_space<vmem>>, vector<2x16x256xf32>,
    return
  }
  func.func @transform_0(%arg0: i32) -> (i32, i32, i32) {
    %c0_i32 = arith.constant 0 : i32
    %c0_i32_0 = arith.constant 0 : i32
    %c0_i32_1 = arith.constant 0 : i32
    return %arg0, %c0_i32, %c0_i32_0 : i32, i32, i32
  }
  func.func @transform_1(%arg0: i32) -> (i32, i32, i32) {
    %c0_i32 = arith.constant 0 : i32
    %c0_i32_0 = arith.constant 0 : i32
    %c0_i32_1 = arith.constant 0 : i32
    %c0_i32_2 = arith.constant 0 : i32
    return %c0_i32, %c0_i32_0, %c0_i32_1 : i32, i32, i32
  }
  func.func @transform_2(%arg0: i32) -> (i32, i32) {
    %c0_i32 = arith.constant 0 : i32
    %c0_i32_0 = arith.constant 0 : i32
    %c0_i32_1 = arith.constant 0 : i32
    return %c0_i32, %c0_i32_0 : i32, i32
  }
  func.func @transform_3(%arg0: i32) -> (i32, i32, i32) {
    %c0_i32 = arith.constant 0 : i32
    %c0_i32_0 = arith.constant 0 : i32
    %c0_i32_1 = arith.constant 0 : i32
    return %arg0, %c0_i32, %c0_i32_0 : i32, i32, i32
  }
}

</mosaic_0001>

<bundles_post_ra>
// kernel: tpu_custom_call.1
= control target key start
LH: loop header
LB: loop body
LE: loop exit
PB: predicated region body
PF: predicated region fallthrough
CT: control target
= control target key end

     0   :  { %8 = vsyncpa [#allocation3], 0  ;;  %s947_s0 = inlined_call_operand.hbm [shape: f32[2,16,256], index: 0, kind: input, shape index: {}]   ;;  %s948_s1 = inlined_call_operand.hbm [shape: f32[9,16,256], index: 1, kind: input, shape index: {}]   ;;  %s949_s2 = inlined_call_operand.hbm [shape: f32[16,256], index: 2, kind: input, shape index: {}]   ;;  %s950_s3 = inlined_call_operand.hbm [shape: f32[2,16,256], index: 3, kind: output, shape index: {}]  }
   0x1   :  { %9 = vsyncpa [#allocation6], 0 }
   0x2   :  { %10 = vsyncpa [#allocation4], 0  ;;  %s591_s12 = smov [#allocation5]   ;;  %s592_s14 = smov [#allocation2]  }
   0x3   :  { %s28_s13 = sshll.u32 %s591_s12, 4  ;;  %s16_s15 = sshll.u32 %s592_s14, 4  ;;  %s29_s13 = int_to_ptr.vmem [resolvable:$true] %s28_s13  ;;  %s624_s15 = int_to_ptr.vmem [resolvable:$true] %s16_s15 }
   0x4   :  { %s497_s18 = scalar_lea.hbm %s948_s1, 4608 }
   0x5   :  { %p498_p0 = scmp.ne.s32.totalorder %s948_s1, %s497_s18  ;;  %p501_p1 = scmp.lt.u32.totalorder %s497_s18, %s948_s1 }
   0x7   :  { %p503_p2 = pnand %p501_p1, %p498_p0 }
   0x9   :  { %506 = shalt.err (!%p503_p2)
}
   0xa   :  { %s507_s23 = scalar_lea.vmem %s29_s13, 4608  ;;  %p512_p4 = scmp.lt.s32.totalorder %s29_s13, %s29_s13 }
   0xb   :  { %p508_p3 = scmp.ne.s32.totalorder %s29_s13, %s507_s23  ;;  %p513_p5 = scmp.lt.s32.totalorder %s507_s23, %s507_s23 }
   0xd   :  { %p514_p6 = por %p513_p5, %p512_p4 }
   0xf   :  { %p515_p7 = pnand %p514_p6, %p508_p3 }
  0x11   :  { %518 = shalt.err (!%p515_p7)
}
  0x12   :  { %s593_s24 = smov 256   ;;  %s594_s25 = smov 16  }
  0x13   :  { %34 = dma.hbm_to_vmem [thread:$0]  %s948_s1, 4608, %s29_s13, [#allocation6], %s593_s24, %s593_s24, %s594_s25  }
  0x14   :  { %s519_s30 = scalar_lea.hbm %s947_s0, 1024 }
  0x15   :  { %p520_p8 = scmp.ne.s32.totalorder %s947_s0, %s519_s30  ;;  %p523_p9 = scmp.lt.u32.totalorder %s519_s30, %s947_s0 }
  0x17   :  { %p525_p10 = pnand %p523_p9, %p520_p8 }
  0x19   :  { %528 = shalt.err (!%p525_p10)
}
  0x1a   :  { %s529_s8 = scalar_lea.vmem %s624_s15, 1024  ;;  %p534_p12 = scmp.lt.s32.totalorder %s624_s15, %s624_s15 }
  0x1b   :  { %p530_p11 = scmp.ne.s32.totalorder %s624_s15, %s529_s8  ;;  %p535_p13 = scmp.lt.s32.totalorder %s529_s8, %s529_s8 }
  0x1d   :  { %p536_p0 = por %p535_p13, %p534_p12 }
  0x1f   :  { %p537_p1 = pnand %p536_p0, %p530_p11 }
  0x21   :  { %540 = shalt.err (!%p537_p1)
}
  0x22   :  { %22 = dma.hbm_to_vmem [thread:$0]  %s947_s0, 1024, %s624_s15, [#allocation3], %s593_s24, %s593_s24, %s594_s25  }
  0x23   :  { %s595_s10 = smov [#allocation7]   ;;  %s541_s14 = scalar_lea.hbm %s949_s2, 512 }
  0x24   :  { %s40_s11 = sshll.u32 %s595_s10, 4  ;;  %p542_p2 = scmp.ne.s32.totalorder %s949_s2, %s541_s14  ;;  %s41_s11 = int_to_ptr.vmem [resolvable:$true] %s40_s11 }
  0x25   :  { %p545_p3 = scmp.lt.u32.totalorder %s541_s14, %s949_s2 }
  0x27   :  { %p547_p4 = pnand %p545_p3, %p542_p2 }
  0x29   :  { %550 = shalt.err (!%p547_p4)
}
  0x2a   :  { %s551_s20 = scalar_lea.vmem %s41_s11, 512  ;;  %p556_p6 = scmp.lt.s32.totalorder %s41_s11, %s41_s11 }
  0x2b   :  { %p552_p5 = scmp.ne.s32.totalorder %s41_s11, %s551_s20  ;;  %p557_p7 = scmp.lt.s32.totalorder %s551_s20, %s551_s20 }
  0x2d   :  { %p558_p8 = por %p557_p7, %p556_p6 }
  0x2f   :  { %p559_p9 = pnand %p558_p8, %p552_p5 }
  0x31   :  { %562 = shalt.err (!%p559_p9)
}
  0x32   :  { %46 = dma.hbm_to_vmem [thread:$0]  %s949_s2, 512, %s41_s11, [#allocation6], %s593_s24, %s593_s24, %s594_s25  }
  0x33   :  { %585 = dma.done.wait [#allocation3], 1024  }
  0x34   :  { %586 = vsyncadd [#allocation3], 4294966272 }
  0x35   :  { %587 = dma.done.wait [#allocation6], 5120  }
  0x36   :  { %588 = vsyncadd [#allocation6], 4294962176  ;;  %v676_v0 = vld [vmem:[#allocation2 + $0x20] sm:$0xff]  ;;  %s596_s21 = smov 17   ;;  %v682_v2 = vld [vmem:[#allocation2 + $0x30] sm:$0xff]  ;;  %s597_s2 = smov 15   ;;  %v93_v8 = vlaneseq }
  0x37   :  { %v678_v1 = vld [vmem:[#allocation2] sm:$0xff]  ;;  %81 = vrot.lane.b32.xlu1 %v676_v0, %s596_s21  ;;  %v684_v3 = vld [vmem:[#allocation2 + $0x10] sm:$0xff]  ;;  %v688_v4 = vld [vmem:[#allocation2 + $0x18] sm:$0xff]  ;;  %s598_s22 = smov 1   ;;  %s599_s23 = smov 127  }
  0x38   :  { %77 = vrot.lane.b32.xlu0 %v678_v1, %s596_s21  ;;  %v690_v5 = vld [vmem:[#allocation2 + $0x8] sm:$0xff]  ;;  %v694_v6 = vld [vmem:[#allocation2 + $0x38] sm:$0xff]  ;;  %s600_s26 = smov 113   ;;  %s601_s27 = smov 112   ;;  %v760_v11 = vand.u32 127, %v93_v8  ;;  %v67_v26 = vld [vmem:[#allocation5 + $0x90] sm:$0xff] }
  0x39   :  { %v696_v7 = vld [vmem:[#allocation2 + $0x28] sm:$0xff]  ;;  %s602_s28 = smov 111   ;;  %v68_v27 = vld [vmem:[#allocation5 + $0x98] sm:$0xff]  ;;  %v106_v28 = vld [vmem:[#allocation5 + $0x10] sm:$0xff]  ;;  %v71_v36 = vmul.f32 %v67_v26, %v684_v3  ;;  %v75_v46 = vmul.f32 %v67_v26, %v682_v2  ;;  %s603_s29 = smov [#allocation8]  }
  0x3a   :  { %vm95_vm0 = vcmp.lt.s32.totalorder %v760_v11, 17  ;;  %v65_v29 = vld [vmem:[#allocation5 + $0x80] sm:$0xff]  ;;  %v66_v30 = vld [vmem:[#allocation5 + $0x88] sm:$0xff]  ;;  %v107_v33 = vld [vmem:[#allocation5 + $0x18] sm:$0xff]  ;;  %v72_v37 = vmul.f32 %v68_v27, %v688_v4  ;;  %v76_v47 = vmul.f32 %v68_v27, %v694_v6  ;;  %vm140_vm1 = vcmp.lt.s32.totalorder %v760_v11, 16  ;;  %s471_s30 = sshll.u32 %s603_s29, 4  ;;  %s472_s30 = int_to_ptr.vmem [resolvable:$true] %s471_s30 }
  0x3b   :  { %83 = vrot.lane.b32.xlu1 %v682_v2, %s596_s21  ;;  %v104_v34 = vld [vmem:[#allocation5] sm:$0xff]  ;;  %v105_v35 = vld [vmem:[#allocation5 + $0x8] sm:$0xff]  ;;  %v70_v38 = vmul.f32 %v66_v30, %v690_v5  ;;  %v69_v39 = vmul.f32 %v65_v29, %v678_v1  ;;  %v73_v48 = vmul.f32 %v65_v29, %v676_v0  ;;  %v74_v49 = vmul.f32 %v66_v30, %v696_v7  ;;  %v152_v50 = vld [vmem:[#allocation5 + $0x30] sm:$0xff]  ;;  %s563_s4 = scalar_lea.vmem %s472_s30, 1024  ;;  %p568_p11 = scmp.lt.s32.totalorder %s472_s30, %s472_s30 }
  0x3c   :  { %79 = vrot.lane.b32.xlu0 %v684_v3, %s596_s21  ;;  %v153_v55 = vld [vmem:[#allocation5 + $0x38] sm:$0xff]  ;;  %v150_v56 = vld [vmem:[#allocation5 + $0x20] sm:$0xff]  ;;  %v151_v57 = vld [vmem:[#allocation5 + $0x28] sm:$0xff]  ;;  %vm186_vm2 = vcmp.lt.s32.totalorder %v760_v11, 15  ;;  %vm232_vm3 = vcmp.lt.s32.totalorder %v760_v11, 1  ;;  %vm278_vm4 = vcmp.lt.s32.totalorder %v760_v11, 127  ;;  %p564_p10 = scmp.ne.s32.totalorder %s472_s30, %s563_s4  ;;  %p569_p12 = scmp.lt.s32.totalorder %s563_s4, %s563_s4 }
  0x3d   :  { %vm324_vm5 = vcmp.lt.s32.totalorder %v760_v11, 113  ;;  %vm370_vm6 = vcmp.lt.s32.totalorder %v760_v11, 112  ;;  %vm416_vm7 = vcmp.lt.s32.totalorder %v760_v11, 111 }
  0x3e   :  { %p570_p13 = por %p569_p12, %p568_p11 }
  0x3f   :  { %87 = vrot.lane.b32.xlu1 %v688_v4, %s596_s21 }
  0x40   :  { %85 = vrot.lane.b32.xlu0 %v690_v5, %s596_s21  ;;  %p571_p0 = pnand %p570_p13, %p564_p10 }
  0x43   :  { %91 = vrot.lane.b32.xlu1 %v694_v6, %s596_s21 }
  0x44   :  { %89 = vrot.lane.b32.xlu0 %v696_v7, %s596_s21 }
  0x47   :  { %126 = vrot.lane.b32.xlu1 %v684_v3, %s594_s25 }
  0x48   :  { %124 = vrot.lane.b32.xlu0 %v678_v1, %s594_s25 }
  0x4b   :  { %130 = vrot.lane.b32.xlu1 %v682_v2, %s594_s25 }
  0x4c   :  { %128 = vrot.lane.b32.xlu0 %v676_v0, %s594_s25 }
  0x4f   :  { %134 = vrot.lane.b32.xlu1 %v688_v4, %s594_s25 }
  0x50   :  { %132 = vrot.lane.b32.xlu0 %v690_v5, %s594_s25 }
  0x53   :  { %138 = vrot.lane.b32.xlu1 %v694_v6, %s594_s25 }
  0x54   :  { %136 = vrot.lane.b32.xlu0 %v696_v7, %s594_s25 }
  0x57   :  { %172 = vrot.lane.b32.xlu1 %v684_v3, %s597_s2 }
  0x58   :  { %170 = vrot.lane.b32.xlu0 %v678_v1, %s597_s2 }
  0x5b   :  { %176 = vrot.lane.b32.xlu1 %v682_v2, %s597_s2 }
  0x5c   :  { %174 = vrot.lane.b32.xlu0 %v676_v0, %s597_s2 }
  0x5f   :  { %180 = vrot.lane.b32.xlu1 %v688_v4, %s597_s2 }
  0x60   :  { %178 = vrot.lane.b32.xlu0 %v690_v5, %s597_s2 }
  0x63   :  { %184 = vrot.lane.b32.xlu1 %v694_v6, %s597_s2 }
  0x64   :  { %182 = vrot.lane.b32.xlu0 %v696_v7, %s597_s2 }
  0x67   :  { %218 = vrot.lane.b32.xlu1 %v684_v3, %s598_s22 }
  0x68   :  { %216 = vrot.lane.b32.xlu0 %v678_v1, %s598_s22 }
  0x6b   :  { %222 = vrot.lane.b32.xlu1 %v682_v2, %s598_s22 }
  0x6c   :  { %220 = vrot.lane.b32.xlu0 %v676_v0, %s598_s22 }
  0x6f   :  { %226 = vrot.lane.b32.xlu1 %v688_v4, %s598_s22 }
  0x70   :  { %224 = vrot.lane.b32.xlu0 %v690_v5, %s598_s22 }
  0x73   :  { %230 = vrot.lane.b32.xlu1 %v694_v6, %s598_s22 }
  0x74   :  { %228 = vrot.lane.b32.xlu0 %v696_v7, %s598_s22 }
  0x77   :  { %264 = vrot.lane.b32.xlu1 %v684_v3, %s599_s23 }
  0x78   :  { %262 = vrot.lane.b32.xlu0 %v678_v1, %s599_s23 }
  0x7b   :  { %268 = vrot.lane.b32.xlu1 %v682_v2, %s599_s23 }
  0x7c   :  { %266 = vrot.lane.b32.xlu0 %v676_v0, %s599_s23 }
  0x7f   :  { %272 = vrot.lane.b32.xlu1 %v688_v4, %s599_s23 }
  0x80   :  { %270 = vrot.lane.b32.xlu0 %v690_v5, %s599_s23 }
  0x83   :  { %276 = vrot.lane.b32.xlu1 %v694_v6, %s599_s23 }
  0x84   :  { %274 = vrot.lane.b32.xlu0 %v696_v7, %s599_s23 }
  0x87   :  { %310 = vrot.lane.b32.xlu1 %v684_v3, %s600_s26 }
  0x88   :  { %308 = vrot.lane.b32.xlu0 %v678_v1, %s600_s26 }
  0x8b   :  { %314 = vrot.lane.b32.xlu1 %v682_v2, %s600_s26 }
  0x8c   :  { %312 = vrot.lane.b32.xlu0 %v676_v0, %s600_s26 }
  0x8f   :  { %318 = vrot.lane.b32.xlu1 %v688_v4, %s600_s26 }
  0x90   :  { %316 = vrot.lane.b32.xlu0 %v690_v5, %s600_s26 }
  0x93   :  { %322 = vrot.lane.b32.xlu1 %v694_v6, %s600_s26 }
  0x94   :  { %320 = vrot.lane.b32.xlu0 %v696_v7, %s600_s26 }
  0x97   :  { %356 = vrot.lane.b32.xlu1 %v684_v3, %s601_s27 }
  0x98   :  { %354 = vrot.lane.b32.xlu0 %v678_v1, %s601_s27 }
  0x9b   :  { %360 = vrot.lane.b32.xlu1 %v682_v2, %s601_s27 }
  0x9c   :  { %358 = vrot.lane.b32.xlu0 %v676_v0, %s601_s27 }
  0x9f   :  { %364 = vrot.lane.b32.xlu1 %v688_v4, %s601_s27 }
  0xa0   :  { %362 = vrot.lane.b32.xlu0 %v690_v5, %s601_s27 }
  0xa3   :  { %368 = vrot.lane.b32.xlu1 %v694_v6, %s601_s27 }
  0xa4   :  { %366 = vrot.lane.b32.xlu0 %v696_v7, %s601_s27 }
  0xa7   :  { %402 = vrot.lane.b32.xlu1 %v684_v3, %s602_s28 }
  0xa8   :  { %400 = vrot.lane.b32.xlu0 %v678_v1, %s602_s28 }
  0xa9   :  { %v82_v9 = vpop.permute.xlu1 %81 }
  0xaa   :  { %v78_v10 = vpop.permute.xlu0 %77 }
  0xab   :  { %406 = vrot.lane.b32.xlu1 %v682_v2, %s602_s28 }
  0xac   :  { %404 = vrot.lane.b32.xlu0 %v676_v0, %s602_s28 }
  0xad   :  { %v84_v12 = vpop.permute.xlu1 %83 }
  0xae   :  { %v80_v13 = vpop.permute.xlu0 %79 }
  0xaf   :  { %410 = vrot.lane.b32.xlu1 %v688_v4, %s602_s28 }
  0xb0   :  { %408 = vrot.lane.b32.xlu0 %v690_v5, %s602_s28 }
  0xb1   :  { %v88_v14 = vpop.permute.xlu1 %87 }
  0xb2   :  { %v86_v15 = vpop.permute.xlu0 %85  ;;  %v97_v16 = vsel %vm95_vm0, %v80_v13, %v88_v14  ;;  %v101_v17 = vsel %vm95_vm0, %v88_v14, %v80_v13 }
  0xb3   :  { %v96_v18 = vsel %vm95_vm0, %v78_v10, %v86_v15  ;;  %v100_v19 = vsel %vm95_vm0, %v86_v15, %v78_v10  ;;  %414 = vrot.lane.b32.xlu1 %v694_v6, %s602_s28  ;;  %v110_v40 = vmul.f32 %v106_v28, %v101_v17  ;;  %v111_v41 = vmul.f32 %v107_v33, %v97_v16 }
  0xb4   :  { %412 = vrot.lane.b32.xlu0 %v696_v7, %s602_s28  ;;  %v108_v42 = vmul.f32 %v104_v34, %v100_v19  ;;  %v109_v43 = vmul.f32 %v105_v35, %v96_v18 }
  0xb5   :  { %v92_v20 = vpop.permute.xlu1 %91  ;;  %v118_v58 = vadd.f32 %v110_v40, %v71_v36  ;;  %v119_v59 = vadd.f32 %v111_v41, %v72_v37  ;;  %v199_v36 = vld [vmem:[#allocation5 + $0x58] sm:$0xff]  ;;  %v196_v37 = vld [vmem:[#allocation5 + $0x40] sm:$0xff] }
  0xb6   :  { %v90_v21 = vpop.permute.xlu0 %89  ;;  %v99_v22 = vsel %vm95_vm0, %v84_v12, %v92_v20  ;;  %v103_v23 = vsel %vm95_vm0, %v92_v20, %v84_v12  ;;  %v116_v60 = vadd.f32 %v108_v42, %v69_v39  ;;  %v117_v61 = vadd.f32 %v109_v43, %v70_v38  ;;  %v197_v38 = vld [vmem:[#allocation5 + $0x48] sm:$0xff] }
  0xb7   :  { %v98_v24 = vsel %vm95_vm0, %v82_v9, %v90_v21  ;;  %v102_v25 = vsel %vm95_vm0, %v90_v21, %v82_v9  ;;  %v114_v51 = vmul.f32 %v106_v28, %v103_v23  ;;  %v115_v52 = vmul.f32 %v107_v33, %v99_v22 }
  0xb8   :  { %v112_v53 = vmul.f32 %v104_v34, %v102_v25  ;;  %v113_v54 = vmul.f32 %v105_v35, %v98_v24  ;;  %v198_v35 = vld [vmem:[#allocation5 + $0x50] sm:$0xff] }
  0xb9   :  { %v127_v31 = vpop.permute.xlu1 %126  ;;  %v122_v8 = vadd.f32 %v114_v51, %v75_v46  ;;  %v123_v9 = vadd.f32 %v115_v52, %v76_v47 }
  0xba   :  { %v125_v32 = vpop.permute.xlu0 %124  ;;  %v120_v10 = vadd.f32 %v112_v53, %v73_v48  ;;  %v121_v12 = vadd.f32 %v113_v54, %v74_v49 }
  0xbd   :  { %v131_v44 = vpop.permute.xlu1 %130 }
  0xbe   :  { %v129_v45 = vpop.permute.xlu0 %128 }
  0xc1   :  { %v135_v62 = vpop.permute.xlu1 %134 }
  0xc2   :  { %v133_v63 = vpop.permute.xlu0 %132  ;;  %v142_v0 = vsel %vm140_vm1, %v127_v31, %v135_v62  ;;  %v146_v1 = vsel %vm140_vm1, %v135_v62, %v127_v31 }
  0xc3   :  { %v141_v2 = vsel %vm140_vm1, %v125_v32, %v133_v63  ;;  %v145_v3 = vsel %vm140_vm1, %v133_v63, %v125_v32  ;;  %v156_v4 = vmul.f32 %v152_v50, %v146_v1  ;;  %v157_v5 = vmul.f32 %v153_v55, %v142_v0 }
  0xc4   :  { %v154_v6 = vmul.f32 %v150_v56, %v145_v3  ;;  %v155_v7 = vmul.f32 %v151_v57, %v141_v2 }
  0xc5   :  { %v164_v13 = vadd.f32 %v156_v4, %v118_v58  ;;  %v165_v14 = vadd.f32 %v157_v5, %v119_v59  ;;  %v139_v17 = vpop.permute.xlu1 %138 }
  0xc6   :  { %v162_v15 = vadd.f32 %v154_v6, %v116_v60  ;;  %v163_v16 = vadd.f32 %v155_v7, %v117_v61  ;;  %v137_v18 = vpop.permute.xlu0 %136  ;;  %v144_v19 = vsel %vm140_vm1, %v131_v44, %v139_v17  ;;  %v148_v20 = vsel %vm140_vm1, %v139_v17, %v131_v44  ;;  %v244_v7 = vld [vmem:[#allocation5 + $0x70] sm:$0xff] }
  0xc7   :  { %v143_v21 = vsel %vm140_vm1, %v129_v45, %v137_v18  ;;  %v147_v22 = vsel %vm140_vm1, %v137_v18, %v129_v45  ;;  %v160_v23 = vmul.f32 %v152_v50, %v148_v20  ;;  %v161_v24 = vmul.f32 %v153_v55, %v144_v19 }
  0xc8   :  { %v158_v25 = vmul.f32 %v150_v56, %v147_v22  ;;  %v159_v26 = vmul.f32 %v151_v57, %v143_v21 }
  0xc9   :  { %v168_v27 = vadd.f32 %v160_v23, %v122_v8  ;;  %v169_v28 = vadd.f32 %v161_v24, %v123_v9  ;;  %v173_v31 = vpop.permute.xlu1 %172  ;;  %v245_v8 = vld [vmem:[#allocation5 + $0x78] sm:$0xff]  ;;  %v242_v9 = vld [vmem:[#allocation5 + $0x60] sm:$0xff] }
  0xca   :  { %v166_v29 = vadd.f32 %v158_v25, %v120_v10  ;;  %v167_v30 = vadd.f32 %v159_v26, %v121_v12  ;;  %v171_v32 = vpop.permute.xlu0 %170  ;;  %v243_v10 = vld [vmem:[#allocation5 + $0x68] sm:$0xff] }
  0xcd   :  { %v177_v33 = vpop.permute.xlu1 %176 }
  0xce   :  { %v175_v34 = vpop.permute.xlu0 %174 }
  0xd1   :  { %v181_v39 = vpop.permute.xlu1 %180 }
  0xd2   :  { %v179_v40 = vpop.permute.xlu0 %178  ;;  %v188_v41 = vsel %vm186_vm2, %v173_v31, %v181_v39  ;;  %v192_v42 = vsel %vm186_vm2, %v181_v39, %v173_v31 }
  0xd3   :  { %v187_v43 = vsel %vm186_vm2, %v171_v32, %v179_v40  ;;  %v191_v44 = vsel %vm186_vm2, %v179_v40, %v171_v32  ;;  %v202_v45 = vmul.f32 %v198_v35, %v192_v42  ;;  %v203_v46 = vmul.f32 %v199_v36, %v188_v41 }
  0xd4   :  { %v200_v47 = vmul.f32 %v196_v37, %v191_v44  ;;  %v201_v48 = vmul.f32 %v197_v38, %v187_v43 }
  0xd5   :  { %v210_v49 = vadd.f32 %v202_v45, %v164_v13  ;;  %v211_v50 = vadd.f32 %v203_v46, %v165_v14  ;;  %v185_v53 = vpop.permute.xlu1 %184 }
  0xd6   :  { %v208_v51 = vadd.f32 %v200_v47, %v162_v15  ;;  %v209_v52 = vadd.f32 %v201_v48, %v163_v16  ;;  %v183_v54 = vpop.permute.xlu0 %182  ;;  %v190_v55 = vsel %vm186_vm2, %v177_v33, %v185_v53  ;;  %v194_v56 = vsel %vm186_vm2, %v185_v53, %v177_v33 }
  0xd7   :  { %v189_v57 = vsel %vm186_vm2, %v175_v34, %v183_v54  ;;  %v193_v58 = vsel %vm186_vm2, %v183_v54, %v175_v34  ;;  %v206_v59 = vmul.f32 %v198_v35, %v194_v56  ;;  %v207_v60 = vmul.f32 %v199_v36, %v190_v55 }
  0xd8   :  { %v204_v61 = vmul.f32 %v196_v37, %v193_v58  ;;  %v205_v62 = vmul.f32 %v197_v38, %v189_v57 }
  0xd9   :  { %v214_v63 = vadd.f32 %v206_v59, %v168_v27  ;;  %v215_v0 = vadd.f32 %v207_v60, %v169_v28  ;;  %v219_v3 = vpop.permute.xlu1 %218  ;;  %v290_v60 = vld [vmem:[#allocation5 + $0xb0] sm:$0xff] }
  0xda   :  { %v212_v1 = vadd.f32 %v204_v61, %v166_v29  ;;  %v213_v2 = vadd.f32 %v205_v62, %v167_v30  ;;  %v217_v4 = vpop.permute.xlu0 %216  ;;  %v291_v61 = vld [vmem:[#allocation5 + $0xb8] sm:$0xff] }
  0xdd   :  { %v223_v5 = vpop.permute.xlu1 %222 }
  0xde   :  { %v221_v6 = vpop.permute.xlu0 %220 }
  0xe1   :  { %v227_v12 = vpop.permute.xlu1 %226 }
  0xe2   :  { %v225_v13 = vpop.permute.xlu0 %224  ;;  %v234_v14 = vsel %vm232_vm3, %v219_v3, %v227_v12  ;;  %v238_v15 = vsel %vm232_vm3, %v227_v12, %v219_v3 }
  0xe3   :  { %v233_v16 = vsel %vm232_vm3, %v217_v4, %v225_v13  ;;  %v237_v17 = vsel %vm232_vm3, %v225_v13, %v217_v4  ;;  %v248_v18 = vmul.f32 %v244_v7, %v238_v15  ;;  %v249_v19 = vmul.f32 %v245_v8, %v234_v14 }
  0xe4   :  { %v246_v20 = vmul.f32 %v242_v9, %v237_v17  ;;  %v247_v21 = vmul.f32 %v243_v10, %v233_v16  ;;  %v336_v17 = vld [vmem:[#allocation5 + $0xd0] sm:$0xff] }
  0xe5   :  { %v256_v22 = vadd.f32 %v248_v18, %v210_v49  ;;  %v257_v23 = vadd.f32 %v249_v19, %v211_v50  ;;  %v231_v26 = vpop.permute.xlu1 %230  ;;  %v337_v18 = vld [vmem:[#allocation5 + $0xd8] sm:$0xff] }
  0xe6   :  { %v818_v24 = vadd.f32 %v246_v20, %v208_v51  ;;  %v820_v25 = vadd.f32 %v247_v21, %v209_v52  ;;  %v229_v27 = vpop.permute.xlu0 %228  ;;  %v236_v28 = vsel %vm232_vm3, %v223_v5, %v231_v26  ;;  %v240_v29 = vsel %vm232_vm3, %v231_v26, %v223_v5 }
  0xe7   :  { %v235_v30 = vsel %vm232_vm3, %v221_v6, %v229_v27  ;;  %v239_v31 = vsel %vm232_vm3, %v229_v27, %v221_v6  ;;  %v252_v32 = vmul.f32 %v244_v7, %v240_v29  ;;  %v253_v33 = vmul.f32 %v245_v8, %v236_v28 }
  0xe8   :  { %v250_v34 = vmul.f32 %v242_v9, %v239_v31  ;;  %v251_v35 = vmul.f32 %v243_v10, %v235_v30 }
  0xe9   :  { %v830_v36 = vadd.f32 %v252_v32, %v214_v63  ;;  %v832_v37 = vadd.f32 %v253_v33, %v215_v0  ;;  %v265_v40 = vpop.permute.xlu1 %264  ;;  %v288_v0 = vld [vmem:[#allocation5 + $0xa0] sm:$0xff]  ;;  %v335_v32 = vld [vmem:[#allocation5 + $0xc8] sm:$0xff] }
  0xea   :  { %v834_v38 = vadd.f32 %v250_v34, %v212_v1  ;;  %v836_v39 = vadd.f32 %v251_v35, %v213_v2  ;;  %v263_v41 = vpop.permute.xlu0 %262  ;;  %v289_v1 = vld [vmem:[#allocation5 + $0xa8] sm:$0xff] }
  0xed   :  { %v269_v42 = vpop.permute.xlu1 %268 }
  0xee   :  { %v267_v43 = vpop.permute.xlu0 %266 }
  0xf1   :  { %v273_v44 = vpop.permute.xlu1 %272 }
  0xf2   :  { %v271_v45 = vpop.permute.xlu0 %270  ;;  %v280_v62 = vsel %vm278_vm4, %v265_v40, %v273_v44  ;;  %v284_v63 = vsel %vm278_vm4, %v273_v44, %v265_v40 }
  0xf3   :  { %v279_v2 = vsel %vm278_vm4, %v263_v41, %v271_v45  ;;  %v283_v3 = vsel %vm278_vm4, %v271_v45, %v263_v41  ;;  %v294_v4 = vmul.f32 %v290_v60, %v280_v62  ;;  %v295_v5 = vmul.f32 %v291_v61, %v284_v63  ;;  %v382_v41 = vld [vmem:[#allocation5 + $0xf0] sm:$0xff]  ;;  %v380_v45 = vld [vmem:[#allocation5 + $0xe0] sm:$0xff] }
  0xf4   :  { %v292_v8 = vmul.f32 %v288_v0, %v279_v2  ;;  %v293_v9 = vmul.f32 %v289_v1, %v283_v3 }
  0xf5   :  { %v277_v46 = vpop.permute.xlu1 %276  ;;  %v302_v15 = vadd.f32 %v294_v4, %v256_v22  ;;  %v303_v16 = vadd.f32 %v295_v5, %v257_v23  ;;  %v334_v23 = vld [vmem:[#allocation5 + $0xc0] sm:$0xff] }
  0xf6   :  { %v275_v47 = vpop.permute.xlu0 %274  ;;  %v282_v10 = vsel %vm278_vm4, %v269_v42, %v277_v46  ;;  %v286_v12 = vsel %vm278_vm4, %v277_v46, %v269_v42  ;;  %v300_v27 = vadd.f32 %v292_v8, %v818_v24  ;;  %v301_v28 = vadd.f32 %v293_v9, %v820_v25  ;;  %v383_v42 = vld [vmem:[#allocation5 + $0xf8] sm:$0xff]  ;;  %v381_v46 = vld [vmem:[#allocation5 + $0xe8] sm:$0xff] }
  0xf7   :  { %v281_v13 = vsel %vm278_vm4, %v267_v43, %v275_v47  ;;  %v285_v14 = vsel %vm278_vm4, %v275_v47, %v267_v43  ;;  %v298_v29 = vmul.f32 %v290_v60, %v282_v10  ;;  %v299_v30 = vmul.f32 %v291_v61, %v286_v12 }
  0xf8   :  { %v296_v31 = vmul.f32 %v288_v0, %v281_v13  ;;  %v297_v22 = vmul.f32 %v289_v1, %v285_v14  ;;  %v428_v13 = vld [vmem:[#allocation5 + $0x110] sm:$0xff] }
  0xf9   :  { %v311_v48 = vpop.permute.xlu1 %310 }
  0xfa   :  { %v309_v49 = vpop.permute.xlu0 %308  ;;  %v305_v2 = vadd.f32 %v297_v22, %v836_v39 }
  0xfd   :  { %v315_v50 = vpop.permute.xlu1 %314 }
  0xfe   :  { %v838_v51 = vpop.permute.xlu0 %312 }
 0x101   :  { %v319_v52 = vpop.permute.xlu1 %318 }
 0x102   :  { %v317_v53 = vpop.permute.xlu0 %316  ;;  %v326_v19 = vsel %vm324_vm5, %v311_v48, %v319_v52  ;;  %v330_v20 = vsel %vm324_vm5, %v319_v52, %v311_v48 }
 0x103   :  { %v325_v33 = vsel %vm324_vm5, %v309_v49, %v317_v53  ;;  %v329_v34 = vsel %vm324_vm5, %v317_v53, %v309_v49  ;;  %v340_v35 = vmul.f32 %v336_v17, %v326_v19  ;;  %v341_v40 = vmul.f32 %v337_v18, %v330_v20  ;;  %v427_v19 = vld [vmem:[#allocation5 + $0x108] sm:$0xff] }
 0x104   :  { %v307_v53 = vadd.f32 %v299_v30, %v832_v37  ;;  %v339_v60 = vmul.f32 %v335_v32, %v329_v34  ;;  %v304_v37 = vadd.f32 %v296_v31, %v834_v38 }
 0x105   :  { %v323_v54 = vpop.permute.xlu1 %322  ;;  %v348_v3 = vadd.f32 %v340_v35, %v302_v15  ;;  %v349_v4 = vadd.f32 %v341_v40, %v303_v16 }
 0x106   :  { %v840_v55 = vpop.permute.xlu0 %320  ;;  %v328_v24 = vsel %vm324_vm5, %v315_v50, %v323_v54  ;;  %v332_v25 = vsel %vm324_vm5, %v323_v54, %v315_v50  ;;  %v306_v50 = vadd.f32 %v298_v29, %v830_v36  ;;  %v338_v54 = vmul.f32 %v334_v23, %v325_v33 }
 0x107   :  { %v344_v61 = vmul.f32 %v336_v17, %v328_v24  ;;  %v345_v62 = vmul.f32 %v337_v18, %v332_v25  ;;  %v347_v8 = vadd.f32 %v339_v60, %v301_v28  ;;  %v429_v17 = vld [vmem:[#allocation5 + $0x118] sm:$0xff]  ;;  %v426_v18 = vld [vmem:[#allocation5 + $0x100] sm:$0xff] }
 0x109   :  { %v357_v56 = vpop.permute.xlu1 %356  ;;  %v353_v10 = vadd.f32 %v345_v62, %v307_v53 }
 0x10a   :  { %v355_v57 = vpop.permute.xlu0 %354 }
 0x10d   :  { %v843_v58 = vpop.permute.xlu1 %360 }
 0x10e   :  { %v845_v59 = vpop.permute.xlu0 %358 }
 0x111   :  { %v365_v6 = vpop.permute.xlu1 %364 }
 0x112   :  { %v363_v7 = vpop.permute.xlu0 %362  ;;  %v372_v43 = vsel %vm370_vm6, %v357_v56, %v365_v6  ;;  %v376_v44 = vsel %vm370_vm6, %v365_v6, %v357_v56  ;;  %v327_v56 = vsel %vm324_vm5, %v838_v51, %v840_v55 }
 0x113   :  { %v371_v47 = vsel %vm370_vm6, %v355_v57, %v363_v7  ;;  %v375_v48 = vsel %vm370_vm6, %v363_v7, %v355_v57  ;;  %v331_v57 = vsel %vm324_vm5, %v840_v55, %v838_v51  ;;  %v386_v63 = vmul.f32 %v382_v41, %v372_v43  ;;  %v447_v43 = vld [vmem:[#allocation7 + $0x8] sm:$0xff] }
 0x114   :  { %v387_v0 = vmul.f32 %v383_v42, %v376_v44  ;;  %v384_v1 = vmul.f32 %v380_v45, %v371_v47  ;;  %v385_v36 = vmul.f32 %v381_v46, %v375_v48  ;;  %v346_v7 = vadd.f32 %v338_v54, %v300_v27 }
 0x115   :  { %v369_v21 = vpop.permute.xlu1 %368  ;;  %v352_v55 = vadd.f32 %v344_v61, %v306_v50  ;;  %v342_v12 = vmul.f32 %v334_v23, %v327_v56  ;;  %v343_v38 = vmul.f32 %v335_v32, %v331_v57  ;;  %v394_v39 = vadd.f32 %v386_v63, %v348_v3  ;;  %v448_v32 = vld [vmem:[#allocation7 + $0x10] sm:$0xff] }
 0x116   :  { %v869_v26 = vpop.permute.xlu0 %366  ;;  %v374_v9 = vsel %vm370_vm6, %v843_v58, %v369_v21  ;;  %v378_v51 = vsel %vm370_vm6, %v369_v21, %v843_v58  ;;  %v395_v14 = vadd.f32 %v387_v0, %v349_v4  ;;  %v392_v15 = vadd.f32 %v384_v1, %v346_v7 }
 0x117   :  { %v393_v16 = vadd.f32 %v385_v36, %v347_v8  ;;  %v390_v20 = vmul.f32 %v382_v41, %v374_v9  ;;  %v391_v27 = vmul.f32 %v383_v42, %v378_v51  ;;  %v373_v28 = vsel %vm370_vm6, %v845_v59, %v869_v26  ;;  %v449_v41 = vld [vmem:[#allocation7 + $0x18] sm:$0xff]  ;;  %v446_v42 = vld [vmem:[#allocation7] sm:$0xff] }
 0x118   :  { %v377_v58 = vsel %vm370_vm6, %v869_v26, %v845_v59  ;;  %v350_v59 = vadd.f32 %v342_v12, %v304_v37  ;;  %v351_v26 = vadd.f32 %v343_v38, %v305_v2  ;;  %v388_v24 = vmul.f32 %v380_v45, %v373_v28 }
 0x119   :  { %v403_v49 = vpop.permute.xlu1 %402  ;;  %v389_v25 = vmul.f32 %v381_v46, %v377_v58  ;;  %v398_v53 = vadd.f32 %v390_v20, %v352_v55  ;;  %v399_v54 = vadd.f32 %v391_v27, %v353_v10 }
 0x11a   :  { %v401_v52 = vpop.permute.xlu0 %400  ;;  %v396_v36 = vadd.f32 %v388_v24, %v350_v59 }
 0x11b   :  { %v397_v37 = vadd.f32 %v389_v25, %v351_v26 }
 0x11d   :  { %v407_v5 = vpop.permute.xlu1 %406 }
 0x11e   :  { %v405_v6 = vpop.permute.xlu0 %404 }
 0x121   :  { %v411_v21 = vpop.permute.xlu1 %410 }
 0x122   :  { %v409_v29 = vpop.permute.xlu0 %408  ;;  %v418_v30 = vsel %vm416_vm7, %v403_v49, %v411_v21  ;;  %v422_v31 = vsel %vm416_vm7, %v411_v21, %v403_v49 }
 0x123   :  { %v417_v22 = vsel %vm416_vm7, %v401_v52, %v409_v29  ;;  %v421_v23 = vsel %vm416_vm7, %v409_v29, %v401_v52  ;;  %v432_v33 = vmul.f32 %v428_v13, %v418_v30  ;;  %v433_v34 = vmul.f32 %v429_v17, %v422_v31 }
 0x124   :  { %v430_v35 = vmul.f32 %v426_v18, %v417_v22  ;;  %v431_v40 = vmul.f32 %v427_v19, %v421_v23 }
 0x125   :  { %v440_v44 = vadd.f32 %v432_v33, %v394_v39  ;;  %v441_v47 = vadd.f32 %v433_v34, %v395_v14  ;;  %v415_v50 = vpop.permute.xlu1 %414 }
 0x126   :  { %v438_v48 = vadd.f32 %v430_v35, %v392_v15  ;;  %v439_v49 = vadd.f32 %v431_v40, %v393_v16  ;;  %v420_v52 = vsel %vm416_vm7, %v407_v5, %v415_v50  ;;  %v424_v60 = vsel %vm416_vm7, %v415_v50, %v407_v5  ;;  %v413_v61 = vpop.permute.xlu0 %412 }
 0x127   :  { %v452_v62 = vadd.f32 %v448_v32, %v440_v44  ;;  %v453_v45 = vadd.f32 %v449_v41, %v441_v47  ;;  %v436_v57 = vmul.f32 %v428_v13, %v420_v52  ;;  %v437_v63 = vmul.f32 %v429_v17, %v424_v60 }
 0x128   :  { %v450_v46 = vadd.f32 %v446_v42, %v438_v48  ;;  %v451_v56 = vadd.f32 %v447_v43, %v439_v49  ;;  %v419_v0 = vsel %vm416_vm7, %v405_v6, %v413_v61  ;;  %v423_v1 = vsel %vm416_vm7, %v413_v61, %v405_v6 }
 0x129   :  { %460 = vst [vmem:[#allocation8 + $0x10] sm:$0xff] %v452_v62  ;;  %461 = vst [vmem:[#allocation8 + $0x18] sm:$0xff] %v453_v45  ;;  %v434_v2 = vmul.f32 %v426_v18, %v419_v0  ;;  %v435_v3 = vmul.f32 %v427_v19, %v423_v1  ;;  %v444_v4 = vadd.f32 %v436_v57, %v398_v53 }
 0x12a   :  { %458 = vst [vmem:[#allocation8] sm:$0xff] %v450_v46  ;;  %459 = vst [vmem:[#allocation8 + $0x8] sm:$0xff] %v451_v56  ;;  %v445_v5 = vadd.f32 %v437_v63, %v399_v54 }
 0x12b   :  { %v442_v7 = vadd.f32 %v434_v2, %v396_v36  ;;  %v443_v8 = vadd.f32 %v435_v3, %v397_v37  ;;  %v456_v9 = vadd.f32 %v448_v32, %v444_v4 }
 0x12c   :  { %v457_v51 = vadd.f32 %v449_v41, %v445_v5 }
 0x12d   :  { %v454_v55 = vadd.f32 %v446_v42, %v442_v7  ;;  %v455_v10 = vadd.f32 %v447_v43, %v443_v8  ;;  %464 = vst [vmem:[#allocation8 + $0x30] sm:$0xff] %v456_v9 }
 0x12e   :  { %465 = vst [vmem:[#allocation8 + $0x38] sm:$0xff] %v457_v51 }
 0x12f   :  { %462 = vst [vmem:[#allocation8 + $0x20] sm:$0xff] %v454_v55  ;;  %463 = vst [vmem:[#allocation8 + $0x28] sm:$0xff] %v455_v10 }
 0x130   :  { %574 = shalt.err (!%p571_p0)
}
 0x131   :  { %s575_s7 = scalar_lea.hbm %s950_s3, 1024 }
 0x132   :  { %p576_p1 = scmp.ne.s32.totalorder %s950_s3, %s575_s7  ;;  %p579_p2 = scmp.lt.u32.totalorder %s575_s7, %s950_s3 }
 0x134   :  { %p581_p3 = pnand %p579_p2, %p576_p1 }
 0x136   :  { %584 = shalt.err (!%p581_p3)
}
 0x137   :  { %477 = dma.vmem_to_hbm [thread:$0]  %s472_s30, 1024, %s950_s3, [#allocation4], %s593_s24, %s593_s24, %s594_s25  }
 0x138   :  { %589 = dma.done.wait [#allocation4], 1024  }
 0x139   :  { %590 = vsyncadd [#allocation4], 4294966272 }
 0x13a   :  { %481 = vsyncpa [#allocation3], 1 }
 0x13b   :  { %482 = vsyncpa [#allocation6], 1 }
 0x13c   :  { %483 = vsyncpa [#allocation4], 1 }

</bundles_post_ra>
